<compile_context>
chip_gen: v7x
topology: tpu7x:2x2x1
jax: 0.10.0
libtpu: 0.0.40
codegen_flags: <defaults>
</compile_context>

<pallas_src>
import functools

import jax
import jax.numpy as jnp
from jax import lax
from jax.experimental import pallas as pl
from jax.experimental.pallas import tpu as pltpu


def _round_up(x, m):
    return ((x + m - 1) // m) * m


def _cdiv(a, b):
    return -(-a // b)


def _tversky_kernel(logits_ref, labels_ref, out_ref, *,
                    hw, hw_block, blocks_per_split, num_classes, apply_mask):
    s = pl.program_id(1)          # pixel-range split (v7x second TensorCore)
    j = pl.program_id(2)          # pixel block within the split (reduction)

    @pl.when(j == 0)
    def _init():
        out_ref[...] = jnp.zeros_like(out_ref)

    x = logits_ref[...].astype(jnp.float32)      # (nb, C, T): classes on sublanes
    lbl = labels_ref[...].astype(jnp.int32)      # (nb, 1, T)

    if apply_mask:
        # Ragged tail: mask BEFORE exp/compare so unspecified boundary-block
        # data (possibly NaN/Inf) can never reach the sums.
        blk = s * blocks_per_split + j
        pix = blk * hw_block + lax.broadcasted_iota(jnp.int32, (1, 1, hw_block), 2)
        valid = pix < hw
        x = jnp.where(valid, x, 0.0)
        lbl = jnp.where(valid, lbl, -1)          # never matches any class id

    # Softmax pieces over the class (sublane) axis.
    m = jnp.max(x, axis=1, keepdims=True)        # (nb, 1, T)
    e = jnp.exp(x - m)                           # (nb, C, T)
    z = jnp.sum(e, axis=1, keepdims=True)        # (nb, 1, T)
    inv_z = pl.reciprocal(z, approx=False)       # exact: keeps ST = label counts

    # Scaled one-hot: t'[b, c, k] = invZ[b, k] if lbl[b, k] == c else 0.
    class_ids = lax.broadcasted_iota(jnp.int32, (1, num_classes, 1), 1)
    t_scaled = jnp.where(class_ids == lbl, inv_z, 0.0)     # (nb, C, T)

    # One MXU contraction per step replaces the three lane-reduction trees:
    #   M[b, i, c] = sum_k p[b, i, k] * one_hot(lbl)[b, c, k]
    m_part = lax.dot_general(
        e, t_scaled,
        dimension_numbers=(((2,), (2,)), ((0,), (0,))),
        preferred_element_type=jnp.float32)                 # (nb, C, C)

    out_ref[...] += jnp.sum(m_part, axis=0)[None, None]     # resident (C, C) acc


def tversky_loss_pallas(pred, target, *, alpha=0.5, beta=0.5, smooth=1.0,
                        tile_hw=65536, vmem_limit_bytes=32 * 1024 * 1024):
    """pred: (N, C, H, W) float logits; target: (N, H, W) integer labels."""
    N, C, H, W = pred.shape
    HW = H * W
    LANE = 128

    logits = pred.reshape(N, C, HW)
    # Keep narrow integer label dtypes (less HBM traffic); widen in-kernel.
    if (not jnp.issubdtype(target.dtype, jnp.integer)) or target.dtype.itemsize > 4:
        target = target.astype(jnp.int32)
    labels = target.reshape(N, 1, HW)

    # Pixel-block sizing: lane-dense multiples of 128 (may overhang HW; the
    # in-kernel mask neutralizes the overhang -- no HBM pad copies).
    tile_hw = max(LANE, _round_up(tile_hw, LANE))
    hw_block = min(tile_hw, _round_up(HW, LANE))
    num_j = _cdiv(HW, hw_block)
    apply_mask = (num_j * hw_block != HW)

    # Small-HW regime: batch images per step when one block covers all pixels.
    if num_j == 1:
        per_img = (_round_up(C, 8) * logits.dtype.itemsize
                   + 8 * labels.dtype.itemsize) * hw_block
        nb_cap = max(1, (8 * 1024 * 1024) // max(per_img, 1))
        n_block = 1
        for d in range(1, N + 1):
            if N % d == 0 and d <= nb_cap:
                n_block = d
    else:
        n_block = 1
    num_n = N // n_block

    # v7x: if only one image-block exists, split the pixel range across a
    # second "parallel" axis so the second TensorCore gets work.
    split = 2 if (num_n == 1 and num_j >= 2 and num_j % 2 == 0) else 1
    j_per = num_j // split

    grid = (num_n, split, j_per)

    kernel = functools.partial(
        _tversky_kernel, hw=HW, hw_block=hw_block, blocks_per_split=j_per,
        num_classes=C, apply_mask=apply_mask)

    out = pl.pallas_call(
        kernel,
        out_shape=jax.ShapeDtypeStruct((num_n, split, C, C), jnp.float32),
        grid_spec=pltpu.PrefetchScalarGridSpec(
            num_scalar_prefetch=0,
            grid=grid,
            in_specs=[
                pl.BlockSpec((n_block, C, hw_block),
                             lambda n, s, j: (n, 0, s * j_per + j)),
                pl.BlockSpec((n_block, 1, hw_block),
                             lambda n, s, j: (n, 0, s * j_per + j)),
            ],
            out_specs=pl.BlockSpec((1, 1, C, C), lambda n, s, j: (n, s, 0, 0)),
        ),
        compiler_params=pltpu.CompilerParams(
            dimension_semantics=("parallel", "parallel", "arbitrary"),
            vmem_limit_bytes=vmem_limit_bytes),
    )(logits, labels)

    # Tiny epilogue in plain JAX: M[i, c] = sum_pixels p_i * 1[label == c].
    M = jnp.sum(out, axis=(0, 1))          # (C, C)
    TP = jnp.diagonal(M)                   # sum(p * t)
    SP = jnp.sum(M, axis=1)                # sum(p) over valid pixels
    ST = jnp.sum(M, axis=0)                # sum(t)  (label counts)
    FP = SP - TP
    FN = ST - TP
    tversky = (TP + smooth) / (TP + alpha * FP + beta * FN + smooth)
    return 1.0 - jnp.mean(tversky)


def tversky_loss_ref(pred, target, alpha=0.5, beta=0.5, smooth=1.0):
    """Pure-JAX reference mirroring the PyTorch taversky_loss."""
    num_classes = pred.shape[1]
    true_1_hot = jax.nn.one_hot(target.astype(jnp.int32), num_classes,
                                dtype=jnp.float32)                # (N,H,W,C)
    true_1_hot = jnp.transpose(true_1_hot, (0, 3, 1, 2))           # (N,C,H,W)
    probas = jax.nn.softmax(pred.astype(jnp.float32), axis=1)
    dims = (0, 2, 3)
    TP = jnp.sum(probas * true_1_hot, dims)
    FP = jnp.sum((1 - true_1_hot) * probas, dims)
    FN = jnp.sum(true_1_hot * (1 - probas), dims)
    tversky = jnp.mean((TP + smooth) / (TP + alpha * FP + beta * FN + smooth))
    return 1.0 - tversky


if __name__ == "__main__":
    key = jax.random.PRNGKey(0)
    k1, k2, k3, k4, k5, k6 = jax.random.split(key, 6)

    # Main shape consistent with the module defaults (num_classes=5).
    N, C, H, W = 2, 5, 16, 16
    pred = jax.random.normal(k1, (N, C, H, W), dtype=jnp.float32)
    target = jax.random.randint(k2, (N, H, W), 0, C, dtype=jnp.int32)
    loss = jax.block_until_ready(tversky_loss_pallas(pred, target))
    ref = tversky_loss_ref(pred, target)
    assert jnp.allclose(loss, ref, atol=2e-3, rtol=2e-3), (loss, ref)

    # Ragged spatial size (HW=100 < 128): masked boundary-block path.
    pred2 = jax.random.normal(k3, (1, C, 10, 10), dtype=jnp.float32)
    target2 = jax.random.randint(k4, (1, 10, 10), 0, C, dtype=jnp.int32)
    loss2 = jax.block_until_ready(tversky_loss_pallas(pred2, target2))
    ref2 = tversky_loss_ref(pred2, target2)
    assert jnp.allclose(loss2, ref2, atol=2e-3, rtol=2e-3), (loss2, ref2)

    # N=1 with several pixel blocks: exercises the 2-way parallel pixel split
    # (second-TensorCore path) together with the ragged-tail mask.
    pred3 = jax.random.normal(k5, (1, C, 60, 60), dtype=jnp.float32)
    target3 = jax.random.randint(k6, (1, 60, 60), 0, C, dtype=jnp.int32)
    loss3 = jax.block_until_ready(tversky_loss_pallas(pred3, target3, tile_hw=512))
    ref3 = tversky_loss_ref(pred3, target3)
    assert jnp.allclose(loss3, ref3, atol=2e-3, rtol=2e-3), (loss3, ref3)

    print("KERNEL_OK")
</pallas_src>

<mosaic_0001>
module attributes {stable_mosaic.version = 11 : i64} {
  func.func @_tversky_kernel(%arg0: i32, %arg1: i32, %arg2: i32, %arg3: memref<2x5x256xf32, #tpu.memory_space<vmem>>, %arg4: memref<2x1x256xi32, #tpu.memory_space<vmem>>, %arg5: memref<1x1x5x5xf32, #tpu.memory_space<vmem>>) attributes {dimension_semantics = [#tpu.dimension_semantics<parallel>, #tpu.dimension_semantics<parallel>, #tpu.dimension_semantics<arbitrary>], iteration_bounds = array<i64: 1, 1, 1>, scalar_prefetch = 0 : i64, scratch_operands = 0 : i64, tpu.core_type = #tpu.core_type<tc>, window_params = [{transform_indices = @transform_0, window_bounds = array<i64: 2, 5, 256>}, {transform_indices = @transform_1, window_bounds = array<i64: 2, 1, 256>}, {transform_indices = @transform_2, window_bounds = array<i64: 1, 1, 5, 5>}]} {
    %c0_i32 = arith.constant 0 : i32
    %0 = arith.cmpi eq, %arg2, %c0_i32 : i32
    %1 = arith.extui %0 : i1 to i32
    %c0_i32_0 = arith.constant 0 : i32
    %2 = arith.cmpi ne, %1, %c0_i32_0 : i32
    scf.if %2 {
      %cst_18 = arith.constant 0.000000e+00 : f32
      %27 = vector.broadcast %cst_18 : f32 to vector<1x1x5x5xf32>
      %c0_19 = arith.constant 0 : index
      %c0_20 = arith.constant 0 : index
      %c0_21 = arith.constant 0 : index
      %c0_22 = arith.constant 0 : index
      %28 = vector.load %arg5[%c0_19, %c0_20, %c0_21, %c0_22] : memref<1x1x5x5xf32, #tpu.memory_space<vmem>>, vector<1x1x5x5xf32>
      tpu.vector_store %arg5[%c0_19, %c0_20, %c0_21, %c0_22], %27 {strides = array<i32>} : memref<1x1x5x5xf32, #tpu.memory_space<vmem>>, vector<1x1x5x5xf32>,
    } else {
    }
    %c0 = arith.constant 0 : index
    %c0_1 = arith.constant 0 : index
    %c0_2 = arith.constant 0 : index
    %3 = vector.load %arg3[%c0, %c0_1, %c0_2] : memref<2x5x256xf32, #tpu.memory_space<vmem>>, vector<2x5x256xf32>
    %c0_3 = arith.constant 0 : index
    %c0_4 = arith.constant 0 : index
    %c0_5 = arith.constant 0 : index
    %4 = vector.load %arg4[%c0_3, %c0_4, %c0_5] : memref<2x1x256xi32, #tpu.memory_space<vmem>>, vector<2x1x256xi32>
    %cst = arith.constant dense<0xFF800000> : vector<2x256xf32>
    %5 = vector.multi_reduction <maximumf>, %3, %cst [1] : vector<2x5x256xf32> to vector<2x256xf32>
    %6 = vector.shape_cast %5 : vector<2x256xf32> to vector<2x1x256xf32>
    %7 = vector.broadcast %6 : vector<2x1x256xf32> to vector<2x5x256xf32>
    %8 = arith.subf %3, %7 : vector<2x5x256xf32>
    %9 = math.exp %8 : vector<2x5x256xf32>
    %cst_6 = arith.constant dense<0.000000e+00> : vector<2x256xf32>
    %10 = vector.multi_reduction <add>, %9, %cst_6 [1] : vector<2x5x256xf32> to vector<2x256xf32>
    %11 = vector.shape_cast %10 : vector<2x256xf32> to vector<2x1x256xf32>
    %12 = tpu.reciprocal %11 : vector<2x1x256xf32> -> vector<2x1x256xf32>
    %13 = tpu.iota {dimensions = array<i32: 1>} : vector<1x5x1xi32>
    %14 = vector.broadcast %13 : vector<1x5x1xi32> to vector<2x5x256xi32>
    %15 = vector.broadcast %4 : vector<2x1x256xi32> to vector<2x5x256xi32>
    %16 = arith.cmpi eq, %14, %15 : vector<2x5x256xi32>
    %cst_7 = arith.constant 0.000000e+00 : f32
    %17 = vector.shape_cast %12 : vector<2x1x256xf32> to vector<2x1x256xf32>
    %18 = vector.broadcast %17 : vector<2x1x256xf32> to vector<2x5x256xf32>
    %19 = vector.broadcast %cst_7 : f32 to vector<2x5x256xf32>
    %20 = arith.select %16, %18, %19 : vector<2x5x256xi1>, vector<2x5x256xf32>
    %cst_8 = arith.constant dense<0.000000e+00> : vector<2x5x5xf32>
    %21 = tpu.matmul %9, %20, %cst_8 {dimension_numbers = #tpu.dot_dimension_numbers<[2], [2], [1], [1], [0, 0, 0, 1, 1, 1], [0], [0]>} : vector<2x5x256xf32>, vector<2x5x256xf32>, vector<2x5x5xf32> -> vector<2x5x5xf32>
    %c0_9 = arith.constant 0 : index
    %c0_10 = arith.constant 0 : index
    %c0_11 = arith.constant 0 : index
    %c0_12 = arith.constant 0 : index
    %22 = vector.load %arg5[%c0_9, %c0_10, %c0_11, %c0_12] : memref<1x1x5x5xf32, #tpu.memory_space<vmem>>, vector<1x1x5x5xf32>
    %cst_13 = arith.constant dense<0.000000e+00> : vector<5x5xf32>
    %23 = vector.multi_reduction <add>, %21, %cst_13 [0] : vector<2x5x5xf32> to vector<5x5xf32>
    %24 = vector.shape_cast %23 : vector<5x5xf32> to vector<1x1x5x5xf32>
    %25 = arith.addf %22, %24 : vector<1x1x5x5xf32>
    %c0_14 = arith.constant 0 : index
    %c0_15 = arith.constant 0 : index
    %c0_16 = arith.constant 0 : index
    %c0_17 = arith.constant 0 : index
    %26 = vector.load %arg5[%c0_14, %c0_15, %c0_16, %c0_17] : memref<1x1x5x5xf32, #tpu.memory_space<vmem>>, vector<1x1x5x5xf32>
    tpu.vector_store %arg5[%c0_14, %c0_15, %c0_16, %c0_17], %25 {strides = array<i32>} : memref<1x1x5x5xf32, #tpu.memory_space<vmem>>, vector<1x1x5x5xf32>,
    return
  }
  func.func @transform_0(%arg0: i32, %arg1: i32, %arg2: i32) -> (i32, i32, i32) {
    %c1_i32 = arith.constant 1 : i32
    %0 = arith.muli %arg1, %c1_i32 : i32
    %1 = arith.addi %0, %arg2 : i32
    %c0_i32 = arith.constant 0 : i32
    %c0_i32_0 = arith.constant 0 : i32
    return %arg0, %c0_i32, %1 : i32, i32, i32
  }
  func.func @transform_1(%arg0: i32, %arg1: i32, %arg2: i32) -> (i32, i32, i32) {
    %c1_i32 = arith.constant 1 : i32
    %0 = arith.muli %arg1, %c1_i32 : i32
    %1 = arith.addi %0, %arg2 : i32
    %c0_i32 = arith.constant 0 : i32
    %c0_i32_0 = arith.constant 0 : i32
    return %arg0, %c0_i32, %1 : i32, i32, i32
  }
  func.func @transform_2(%arg0: i32, %arg1: i32, %arg2: i32) -> (i32, i32, i32, i32) {
    %c0_i32 = arith.constant 0 : i32
    %c0_i32_0 = arith.constant 0 : i32
    %c0_i32_1 = arith.constant 0 : i32
    return %arg0, %arg1, %c0_i32, %c0_i32_0 : i32, i32, i32, i32
  }
}

</mosaic_0001>

<bundles_post_ra>
// kernel: tpu_custom_call.1
= control target key start
LH: loop header
LB: loop body
LE: loop exit
PB: predicated region body
PF: predicated region fallthrough
CT: control target
= control target key end

     0   :  { %vm64_vm0 = vcmask 1044480   ;;  %v137_v57 = vlaneseq  ;;  %vm56_vm5 = vcmask 36864   ;;  %s395_s0 = inlined_call_operand.vmem [shape: f32[2,5,256], index: 0, kind: input, shape index: {}]   ;;  %s396_s1 = inlined_call_operand.vmem [shape: s32[2,1,256], index: 1, kind: input, shape index: {}]   ;;  %s397_s2 = inlined_call_operand.vmem [shape: f32[1,1,5,5], index: 2, kind: output, shape index: {}]  }
   0x1   :  { %v58_v0 = vld [vmem:[%s395_s0] sm:$0x1f]  ;;  %v59_v1 = vld [vmem:[%s395_s0 + $0x8] sm:$0x1f]  ;;  %v60_v2 = vld [vmem:[%s395_s0 + $0x10] sm:$0x1f] }
   0x2   :  { %v65_v3 = vsel %vm64_vm0, %v58_v0, -inf  ;;  %v72_v4 = vsel %vm64_vm0, %v59_v1, -inf  ;;  %v79_v5 = vsel %vm64_vm0, %v60_v2, -inf  ;;  %v61_v9 = vld [vmem:[%s395_s0 + $0x18] sm:$0x1f] }
   0x3   :  { %v66_v6 = vrot.slane %v65_v3, 4  ;;  %v73_v7 = vrot.slane %v72_v4, 4  ;;  %v80_v8 = vrot.slane %v79_v5, 4  ;;  %v86_v10 = vsel %vm64_vm0, %v61_v9, -inf }
   0x4   :  { %v87_v14 = vrot.slane %v86_v10, 4 }
   0x5   :  { %v67_v11 = vmax.f32 %v65_v3, %v66_v6  ;;  %v74_v12 = vmax.f32 %v72_v4, %v73_v7  ;;  %v81_v13 = vmax.f32 %v79_v5, %v80_v8 }
   0x6   :  { %v88_v18 = vmax.f32 %v86_v10, %v87_v14 }
   0x7   :  { %v68_v15 = vrot.slane %v67_v11, 2  ;;  %v75_v16 = vrot.slane %v74_v12, 2  ;;  %v82_v17 = vrot.slane %v81_v13, 2 }
   0x8   :  { %v89_v22 = vrot.slane %v88_v18, 2 }
   0x9   :  { %v69_v19 = vmax.f32 %v67_v11, %v68_v15  ;;  %v76_v20 = vmax.f32 %v74_v12, %v75_v16  ;;  %v83_v21 = vmax.f32 %v81_v13, %v82_v17  ;;  %v62_v11 = vld [vmem:[%s396_s1] sm:$0x3]  ;;  %v63_v13 = vld [vmem:[%s396_s1 + $0x2] sm:$0x3] }
   0xa   :  { %v90_v26 = vmax.f32 %v88_v18, %v89_v22  ;;  %v344_v22 = vmov 0.0  }
   0xb   :  { %v70_v23 = vrot.slane %v69_v19, 1  ;;  %v77_v24 = vrot.slane %v76_v20, 1  ;;  %v84_v25 = vrot.slane %v83_v21, 1  ;;  %57 = vst.msk [vmem:[%s397_s2] sm:$0x1f] %vm56_vm5, %v344_v22 }
   0xc   :  { %v91_v30 = vrot.slane %v90_v26, 1 }
   0xd   :  { %v71_v27 = vmax.f32 %v69_v19, %v70_v23  ;;  %v78_v28 = vmax.f32 %v76_v20, %v77_v24  ;;  %v85_v29 = vmax.f32 %v83_v21, %v84_v25 }
   0xe   :  { %v92_v34 = vmax.f32 %v90_v26, %v91_v30 }
   0xf   :  { %v93_v31 = vsub.f32 %v58_v0, %v71_v27  ;;  %v94_v32 = vsub.f32 %v59_v1, %v78_v28  ;;  %v95_v33 = vsub.f32 %v60_v2, %v85_v29  ;;  %v138_v2 = vshrl.u32 %v137_v57, 7 }
  0x10   :  { %v96_v38 = vsub.f32 %v61_v9, %v92_v34 }
  0x11   :  { %v97_v35 = vmul.f32 1.442695, %v93_v31  ;;  %v99_v36 = vmul.f32 1.442695, %v94_v32  ;;  %v101_v37 = vmul.f32 1.442695, %v95_v33 }
  0x12   :  { %v103_v39 = vmul.f32 1.442695, %v96_v38  ;;  %v145_v9 = vsub.s32 1, %v138_v2  ;;  %v141_v12 = vsub.s32 0, %v138_v2  ;;  %v303_v27 = vld [vmem:[%s397_s2] sm:$0x1f] }
  0x13   :  { %328 = vpow2.f32 %v97_v35 }
  0x14   :  { %330 = vpow2.f32 %v99_v36  ;;  %v146_v14 = vrot.slane %v62_v11, %v145_v9  ;;  %v142_v15 = vrot.slane %v62_v11, %v141_v12  ;;  %v154_v16 = vrot.slane %v63_v13, %v145_v9 }
  0x15   :  { %332 = vpow2.f32 %v101_v37  ;;  %v150_v17 = vrot.slane %v63_v13, %v141_v12 }
  0x16   :  { %334 = vpow2.f32 %v103_v39  ;;  %vm156_vm1 = vcmp.eq.s32.totalorder %v138_v2, %v146_v14  ;;  %vm155_vm2 = vcmp.eq.s32.totalorder %v138_v2, %v142_v15  ;;  %vm158_vm3 = vcmp.eq.s32.totalorder %v138_v2, %v154_v16 }
  0x17   :  { %vm157_vm4 = vcmp.eq.s32.totalorder %v138_v2, %v150_v17 }
  0x1d   :  { %v329_v40 = vpop.eup %328 }
  0x1e   :  { %v331_v41 = vpop.eup %330  ;;  %v105_v42 = vsel %vm64_vm0, %v329_v40, 0.0 }
  0x1f   :  { %v333_v43 = vpop.eup %332  ;;  %v112_v44 = vsel %vm64_vm0, %v331_v41, 0.0  ;;  %v106_v45 = vrot.slane %v105_v42, 4  ;;  %227 = vmatprep.mubr.f32.mxu0 %v331_v41 }
  0x20   :  { %v335_v46 = vpop.eup %334  ;;  %v113_v47 = vrot.slane %v112_v44, 4  ;;  %v119_v48 = vsel %vm64_vm0, %v333_v43, 0.0 }
  0x21   :  { %v126_v49 = vsel %vm64_vm0, %v335_v46, 0.0  ;;  %v107_v50 = vadd.f32 %v106_v45, %v105_v42  ;;  %v120_v51 = vrot.slane %v119_v48, 4  ;;  %297 = vmatprep.mubr.f32.mxu1 %v335_v46 }
  0x22   :  { %v114_v52 = vadd.f32 %v113_v47, %v112_v44  ;;  %v127_v53 = vrot.slane %v126_v49, 4 }
  0x23   :  { %v108_v54 = vrot.slane %v107_v50, 2  ;;  %v121_v55 = vadd.f32 %v120_v51, %v119_v48 }
  0x24   :  { %v115_v56 = vrot.slane %v114_v52, 2  ;;  %v128_v58 = vadd.f32 %v127_v53, %v126_v49 }
  0x25   :  { %v109_v59 = vadd.f32 %v108_v54, %v107_v50  ;;  %v122_v60 = vrot.slane %v121_v55, 2 }
  0x26   :  { %v116_v61 = vadd.f32 %v115_v56, %v114_v52  ;;  %v129_v62 = vrot.slane %v128_v58, 2 }
  0x27   :  { %v110_v63 = vrot.slane %v109_v59, 1  ;;  %v123_v0 = vadd.f32 %v122_v60, %v121_v55 }
  0x28   :  { %v117_v1 = vrot.slane %v116_v61, 1  ;;  %v130_v3 = vadd.f32 %v129_v62, %v128_v58 }
  0x29   :  { %v111_v4 = vadd.f32 %v110_v63, %v109_v59  ;;  %v124_v5 = vrot.slane %v123_v0, 1 }
  0x2a   :  { %v118_v6 = vadd.f32 %v117_v1, %v116_v61  ;;  %v131_v7 = vrot.slane %v130_v3, 1 }
  0x2b   :  { %336 = vrcp.f32 %v111_v4  ;;  %v125_v8 = vadd.f32 %v124_v5, %v123_v0 }
  0x2c   :  { %338 = vrcp.f32 %v118_v6  ;;  %v132_v10 = vadd.f32 %v131_v7, %v130_v3 }
  0x2d   :  { %340 = vrcp.f32 %v125_v8 }
  0x2e   :  { %342 = vrcp.f32 %v132_v10 }
  0x35   :  { %v337_v18 = vpop.eup %336 }
  0x36   :  { %v339_v19 = vpop.eup %338 }
  0x37   :  { %v341_v20 = vpop.eup %340  ;;  %323 = vmatprep.subr.msk.mxu0 %vm156_vm1, %v339_v19 }
  0x38   :  { %v343_v21 = vpop.eup %342  ;;  %324 = vmatpush1.xpose.msk.msra.mxu0 %vm155_vm2, %v337_v18 }
  0x39   :  { %325 = vmatprep.subr.msk.mxu1 %vm158_vm3, %v343_v21 }
  0x3a   :  { %326 = vmatpush1.xpose.msk.msra.mxu1 %vm157_vm4, %v341_v20 }
  0x3b   :  { %228 = vmatmul.mubr.f32.vlgmr.msra.gmra.mrb[0].mxu0 %v329_v40 }
  0x3d   :  { %298 = vmatmul.mubr.f32.vlgmr.msra.gmra.mrb[0].mxu1 %v333_v43 }
 0x10e   :  { %v229_v23 = vpop.f32.mrb[0].mxu0 }
 0x10f   :  { %v305_v24 = vsel %vm56_vm5, %v229_v23, 0.0  ;;  %v231_v25 = vpop.f32.mrb[1].mxu0 }
 0x110   :  { %v299_v26 = vpop.f32.mrb[0].mxu1 }
 0x111   :  { %v306_v28 = vsel %vm56_vm5, %v299_v26, 0.0  ;;  %v301_v29 = vpop.f32.mrb[1].mxu1 }
 0x112   :  { %v307_v30 = vadd.f32 %v306_v28, %v305_v24 }
 0x114   :  { %v308_v31 = vadd.f32 %v307_v30, %v303_v27 }
 0x116   :  { %309 = vst.msk [vmem:[%s397_s2] sm:$0x1f] %vm56_vm5, %v308_v31 }

</bundles_post_ra>
